<compile_context>
chip_gen: v7x
topology: tpu7x:2x2x1
jax: 0.10.0
libtpu: 0.0.40
codegen_flags: <defaults>
</compile_context>

<pallas_src>
import functools

import numpy as np
import jax
import jax.numpy as jnp
from jax.experimental import pallas as pl
from jax.experimental.pallas import tpu as pltpu

LOG_2PI = float(np.log(2.0 * np.pi))


def _round_up(v, mult):
    return (v + mult - 1) // mult * mult


def _cdiv(a, b):
    return (a + b - 1) // b


def _iso_mvn_kernel(x_ref, a_ref, mu_ref, bias_ref, o_ref, *, cardinality, m_per_step):
    """One (batch-tile, m-group) grid step.

    x_ref:    (C, TN, D)     unreplicated inputs; each x_ref[c] is a lane-dense (TN, D) tile
    a_ref:    (C, MG, 1, D)  -0.5 / std
    mu_ref:   (C, MG, 1, D)  mean
    bias_ref: (MG, 1, D)     -0.5 * (C*log(2*pi) + sum_c log std)
    o_ref:    (MG, TN, D)    log-likelihoods for this m-group / batch tile
    """
    # Load x once; it is reused (in vregs) for every m of the group -> no M-fold
    # replication of the dominant input stream, neither in HBM nor in VMEM.
    xs = [x_ref[ci] for ci in range(cardinality)]
    tile_shape = xs[0].shape
    for mi in range(m_per_step):                      # M, C are small & static: unroll
        # initialize the accumulator from the bias broadcast (saves a trailing add)
        acc = jnp.broadcast_to(bias_ref[mi], tile_shape)
        for ci in range(cardinality):
            # (x - mu)^2 form: same op count as the expanded quadratic, but no
            # catastrophic cancellation.
            diff = xs[ci] - mu_ref[ci, mi]            # (TN, D) - (1, D)
            acc = acc + diff * (diff * a_ref[ci, mi])
        o_ref[mi] = acc                               # dense (TN, D) store


def isotropic_mvn_forward(x, means, stds, cardinality, *,
                          target_step_bytes=4 * 1024 * 1024, max_tn=8192):
    """x: (N, in_features); means/stds: (M, D, C). Returns (N, D, M) float32."""
    n, in_features = x.shape
    m, d, c = means.shape
    assert c == cardinality
    # TODO(synk): reflect-pad branch (_pad_value != 0) not implemented; the torch
    # reference only reshapes consistently when in_features % cardinality == 0.
    assert in_features % cardinality == 0, "pad path not supported"
    assert in_features // cardinality == d

    x3 = x.reshape(n, d, c).astype(jnp.float32)
    means = means.astype(jnp.float32)
    stds = stds.astype(jnp.float32)

    # ---- batch-invariant precompute (tiny; single fused XLA pass). `stds` is
    # used directly as the covariance diagonal, matching the torch module. ----
    a = -0.5 / stds                                                   # (M, D, C)
    bias = -0.5 * (cardinality * LOG_2PI
                   + jnp.sum(jnp.log(stds), axis=-1))                 # (M, D)

    # ---- kernel layouts: C on the leading axis so per-c slices are lane-dense
    # (N, D) tiles.  x is NOT replicated across M anywhere. ----
    x_t = jnp.transpose(x3, (2, 0, 1))                                # (C, N, D)
    a_t = jnp.transpose(a, (2, 0, 1))[:, :, None, :]                  # (C, M, 1, D)
    mu_t = jnp.transpose(means, (2, 0, 1))[:, :, None, :]             # (C, M, 1, D)
    bias_t = bias[:, None, :]                                         # (M, 1, D)

    # ---- tile sizing: bytes-per-step target + VMEM-capacity aware ----
    itemsize = 4
    try:
        info = pltpu.get_tpu_info()
        vmem_phys = int(getattr(info, "vmem_capacity_bytes", 64 * 1024 * 1024))
    except Exception:                                  # robust if HW query unavailable
        vmem_phys = 64 * 1024 * 1024                   # v7x per-core minimum
    vmem_budget = min(vmem_phys // 2, 48 * 1024 * 1024)  # headroom for compiler temporaries

    def pick_tn(mg):
        per_row = itemsize * d * 2 * (c + mg)          # double-buffered x + out, per batch row
        params = 2 * itemsize * d * mg * (2 * c + 1)   # a, mu, bias blocks (double-buffered)
        vmem_rows = max((vmem_budget - params) // per_row, 8)
        want_rows = max(target_step_bytes // (itemsize * d * (c + mg)), 8)
        tn = int(min(vmem_rows, want_rows, max_tn))
        tn = max(8, (tn // 8) * 8)
        return min(tn, _round_up(n, 8))

    mg = m
    tn = pick_tn(mg)
    if tn >= n:
        # Single batch tile: try to expose >= 2 'parallel' grid steps so a v7x
        # megacore can shard the work across both TensorCores.
        if n >= 16:
            tn = _round_up(_cdiv(n, 2), 8)
        elif m % 2 == 0 and m >= 2:
            mg = m // 2
            tn = pick_tn(mg)
    else:
        # Balance rows per step to limit padded-tail waste (e.g. n=520 vs tn=512).
        tn = _round_up(_cdiv(n, _cdiv(n, tn)), 8)
    n_tiles = _cdiv(n, tn)
    n_pad = n_tiles * tn
    m_tiles = m // mg

    if n_pad != n:
        x_t = jnp.pad(x_t, ((0, 0), (0, n_pad - n), (0, 0)))

    block_bytes = itemsize * (2 * c * tn * d + 2 * mg * tn * d
                              + 2 * mg * d * (2 * c + 1))
    vmem_limit = int(min(0.85 * vmem_phys,
                         max(1.5 * block_bytes, 32 * 1024 * 1024)))

    cost = pl.CostEstimate(
        flops=4 * c * m * n_pad * d,                   # sub, mul, mul, add per (c, output elem)
        transcendentals=0,
        bytes_accessed=itemsize * (c * n_pad * d + m * n_pad * d + (2 * c + 1) * m * d))

    kernel = functools.partial(_iso_mvn_kernel, cardinality=c, m_per_step=mg)
    out = pl.pallas_call(
        kernel,
        out_shape=jax.ShapeDtypeStruct((m, n_pad, d), jnp.float32),
        grid=(n_tiles, m_tiles),
        in_specs=[
            pl.BlockSpec((c, tn, d), lambda i, j: (0, i, 0)),         # x (block re-used across j)
            pl.BlockSpec((c, mg, 1, d), lambda i, j: (0, j, 0, 0)),   # -0.5/std
            pl.BlockSpec((c, mg, 1, d), lambda i, j: (0, j, 0, 0)),   # mean
            pl.BlockSpec((mg, 1, d), lambda i, j: (j, 0, 0)),         # bias
        ],
        out_specs=pl.BlockSpec((mg, tn, d), lambda i, j: (j, i, 0)),
        compiler_params=pltpu.CompilerParams(
            dimension_semantics=("parallel", "parallel"),
            vmem_limit_bytes=vmem_limit),
        cost_estimate=cost,
    )(x_t, a_t, mu_t, bias_t)

    # (M, N_pad, D) -> (N, D, M): wrapper-side layout plumbing on the
    # unreplicated-size output (the m-on-leading-axis kernel layout keeps all
    # in-kernel ops dense 2-D tiles with zero replication/relayout of x).
    return jnp.transpose(out[:, :n, :], (1, 2, 0))


def reference(x, means, stds, cardinality):
    n, f = x.shape
    m, d, c = means.shape
    xr = x.reshape(n, 1, d, c)
    diff = xr - means[None]                               # (N, M, D, C)
    maha = jnp.sum(diff * diff / stds[None], axis=-1)     # (N, M, D)
    log_det = jnp.sum(jnp.log(stds), axis=-1)             # (M, D)
    lp = -0.5 * (maha + c * LOG_2PI + log_det[None])
    return jnp.transpose(lp, (0, 2, 1))                   # (N, D, M)


if __name__ == "__main__":
    multiplicity = 4
    cardinality = 4
    in_features = 32
    batch = 8
    n_dists = in_features // cardinality  # = 8

    key = jax.random.PRNGKey(0)
    k_mean, k_std, k_x = jax.random.split(key, 3)
    # torch.randn -> standard normal; torch.rand -> uniform(0,1) (lifted to
    # [0.1, 1.0) for numerical stability of the 1/std term).
    means = jax.random.normal(k_mean, (multiplicity, n_dists, cardinality), jnp.float32)
    stds = jax.random.uniform(k_std, (multiplicity, n_dists, cardinality),
                              jnp.float32, minval=0.1, maxval=1.0)
    x = jax.random.normal(k_x, (batch, in_features), jnp.float32)

    out = isotropic_mvn_forward(x, means, stds, cardinality)
    out = jax.block_until_ready(out)
    assert out.shape == (batch, n_dists, multiplicity)

    ref = reference(x, means, stds, cardinality)
    # (x - mu)^2 form -> no cancellation; tight tolerance holds.
    np.testing.assert_allclose(np.asarray(out), np.asarray(ref), rtol=1e-5, atol=1e-6)
    print("KERNEL_OK")
</pallas_src>

<mosaic_0001>
module attributes {stable_mosaic.version = 11 : i64} {
  func.func @_iso_mvn_kernel(%arg0: i32, %arg1: i32, %arg2: memref<4x8x8xf32, #tpu.memory_space<vmem>>, %arg3: memref<4x2x1x8xf32, #tpu.memory_space<vmem>>, %arg4: memref<4x2x1x8xf32, #tpu.memory_space<vmem>>, %arg5: memref<2x1x8xf32, #tpu.memory_space<vmem>>, %arg6: memref<2x8x8xf32, #tpu.memory_space<vmem>>) attributes {dimension_semantics = [#tpu.dimension_semantics<parallel>, #tpu.dimension_semantics<parallel>], iteration_bounds = array<i64: 1, 2>, scalar_prefetch = 0 : i64, scratch_operands = 0 : i64, tpu.core_type = #tpu.core_type<tc>, window_params = [{transform_indices = @transform_0, window_bounds = array<i64: 4, 8, 8>}, {transform_indices = @transform_1, window_bounds = array<i64: 4, 2, 1, 8>}, {transform_indices = @transform_2, window_bounds = array<i64: 4, 2, 1, 8>}, {transform_indices = @transform_3, window_bounds = array<i64: 2, 1, 8>}, {transform_indices = @transform_4, window_bounds = array<i64: 2, 8, 8>}]} {
    %c0 = arith.constant 0 : index
    %c0_0 = arith.constant 0 : index
    %c0_1 = arith.constant 0 : index
    %0 = vector.load %arg2[%c0, %c0_0, %c0_1] : memref<4x8x8xf32, #tpu.memory_space<vmem>>, vector<1x8x8xf32>
    %1 = vector.shape_cast %0 : vector<1x8x8xf32> to vector<8x8xf32>
    %c1 = arith.constant 1 : index
    %c0_2 = arith.constant 0 : index
    %c0_3 = arith.constant 0 : index
    %2 = vector.load %arg2[%c1, %c0_2, %c0_3] : memref<4x8x8xf32, #tpu.memory_space<vmem>>, vector<1x8x8xf32>
    %3 = vector.shape_cast %2 : vector<1x8x8xf32> to vector<8x8xf32>
    %c2 = arith.constant 2 : index
    %c0_4 = arith.constant 0 : index
    %c0_5 = arith.constant 0 : index
    %4 = vector.load %arg2[%c2, %c0_4, %c0_5] : memref<4x8x8xf32, #tpu.memory_space<vmem>>, vector<1x8x8xf32>
    %5 = vector.shape_cast %4 : vector<1x8x8xf32> to vector<8x8xf32>
    %c3 = arith.constant 3 : index
    %c0_6 = arith.constant 0 : index
    %c0_7 = arith.constant 0 : index
    %6 = vector.load %arg2[%c3, %c0_6, %c0_7] : memref<4x8x8xf32, #tpu.memory_space<vmem>>, vector<1x8x8xf32>
    %7 = vector.shape_cast %6 : vector<1x8x8xf32> to vector<8x8xf32>
    %c0_8 = arith.constant 0 : index
    %c0_9 = arith.constant 0 : index
    %c0_10 = arith.constant 0 : index
    %8 = vector.load %arg5[%c0_8, %c0_9, %c0_10] : memref<2x1x8xf32, #tpu.memory_space<vmem>>, vector<1x1x8xf32>
    %9 = vector.shape_cast %8 : vector<1x1x8xf32> to vector<1x8xf32>
    %10 = vector.shape_cast %9 : vector<1x8xf32> to vector<1x8xf32>
    %11 = vector.broadcast %10 : vector<1x8xf32> to vector<8x8xf32>
    %c0_11 = arith.constant 0 : index
    %c0_12 = arith.constant 0 : index
    %c0_13 = arith.constant 0 : index
    %c0_14 = arith.constant 0 : index
    %12 = vector.load %arg4[%c0_11, %c0_12, %c0_13, %c0_14] : memref<4x2x1x8xf32, #tpu.memory_space<vmem>>, vector<1x1x1x8xf32>
    %13 = vector.shape_cast %12 : vector<1x1x1x8xf32> to vector<1x8xf32>
    %14 = vector.broadcast %13 : vector<1x8xf32> to vector<8x8xf32>
    %15 = arith.subf %1, %14 : vector<8x8xf32>
    %c0_15 = arith.constant 0 : index
    %c0_16 = arith.constant 0 : index
    %c0_17 = arith.constant 0 : index
    %c0_18 = arith.constant 0 : index
    %16 = vector.load %arg3[%c0_15, %c0_16, %c0_17, %c0_18] : memref<4x2x1x8xf32, #tpu.memory_space<vmem>>, vector<1x1x1x8xf32>
    %17 = vector.shape_cast %16 : vector<1x1x1x8xf32> to vector<1x8xf32>
    %18 = vector.broadcast %17 : vector<1x8xf32> to vector<8x8xf32>
    %19 = arith.mulf %15, %18 : vector<8x8xf32>
    %20 = arith.mulf %15, %19 : vector<8x8xf32>
    %21 = arith.addf %11, %20 : vector<8x8xf32>
    %c1_19 = arith.constant 1 : index
    %c0_20 = arith.constant 0 : index
    %c0_21 = arith.constant 0 : index
    %c0_22 = arith.constant 0 : index
    %22 = vector.load %arg4[%c1_19, %c0_20, %c0_21, %c0_22] : memref<4x2x1x8xf32, #tpu.memory_space<vmem>>, vector<1x1x1x8xf32>
    %23 = vector.shape_cast %22 : vector<1x1x1x8xf32> to vector<1x8xf32>
    %24 = vector.broadcast %23 : vector<1x8xf32> to vector<8x8xf32>
    %25 = arith.subf %3, %24 : vector<8x8xf32>
    %c1_23 = arith.constant 1 : index
    %c0_24 = arith.constant 0 : index
    %c0_25 = arith.constant 0 : index
    %c0_26 = arith.constant 0 : index
    %26 = vector.load %arg3[%c1_23, %c0_24, %c0_25, %c0_26] : memref<4x2x1x8xf32, #tpu.memory_space<vmem>>, vector<1x1x1x8xf32>
    %27 = vector.shape_cast %26 : vector<1x1x1x8xf32> to vector<1x8xf32>
    %28 = vector.broadcast %27 : vector<1x8xf32> to vector<8x8xf32>
    %29 = arith.mulf %25, %28 : vector<8x8xf32>
    %30 = arith.mulf %25, %29 : vector<8x8xf32>
    %31 = arith.addf %21, %30 : vector<8x8xf32>
    %c2_27 = arith.constant 2 : index
    %c0_28 = arith.constant 0 : index
    %c0_29 = arith.constant 0 : index
    %c0_30 = arith.constant 0 : index
    %32 = vector.load %arg4[%c2_27, %c0_28, %c0_29, %c0_30] : memref<4x2x1x8xf32, #tpu.memory_space<vmem>>, vector<1x1x1x8xf32>
    %33 = vector.shape_cast %32 : vector<1x1x1x8xf32> to vector<1x8xf32>
    %34 = vector.broadcast %33 : vector<1x8xf32> to vector<8x8xf32>
    %35 = arith.subf %5, %34 : vector<8x8xf32>
    %c2_31 = arith.constant 2 : index
    %c0_32 = arith.constant 0 : index
    %c0_33 = arith.constant 0 : index
    %c0_34 = arith.constant 0 : index
    %36 = vector.load %arg3[%c2_31, %c0_32, %c0_33, %c0_34] : memref<4x2x1x8xf32, #tpu.memory_space<vmem>>, vector<1x1x1x8xf32>
    %37 = vector.shape_cast %36 : vector<1x1x1x8xf32> to vector<1x8xf32>
    %38 = vector.broadcast %37 : vector<1x8xf32> to vector<8x8xf32>
    %39 = arith.mulf %35, %38 : vector<8x8xf32>
    %40 = arith.mulf %35, %39 : vector<8x8xf32>
    %41 = arith.addf %31, %40 : vector<8x8xf32>
    %c3_35 = arith.constant 3 : index
    %c0_36 = arith.constant 0 : index
    %c0_37 = arith.constant 0 : index
    %c0_38 = arith.constant 0 : index
    %42 = vector.load %arg4[%c3_35, %c0_36, %c0_37, %c0_38] : memref<4x2x1x8xf32, #tpu.memory_space<vmem>>, vector<1x1x1x8xf32>
    %43 = vector.shape_cast %42 : vector<1x1x1x8xf32> to vector<1x8xf32>
    %44 = vector.broadcast %43 : vector<1x8xf32> to vector<8x8xf32>
    %45 = arith.subf %7, %44 : vector<8x8xf32>
    %c3_39 = arith.constant 3 : index
    %c0_40 = arith.constant 0 : index
    %c0_41 = arith.constant 0 : index
    %c0_42 = arith.constant 0 : index
    %46 = vector.load %arg3[%c3_39, %c0_40, %c0_41, %c0_42] : memref<4x2x1x8xf32, #tpu.memory_space<vmem>>, vector<1x1x1x8xf32>
    %47 = vector.shape_cast %46 : vector<1x1x1x8xf32> to vector<1x8xf32>
    %48 = vector.broadcast %47 : vector<1x8xf32> to vector<8x8xf32>
    %49 = arith.mulf %45, %48 : vector<8x8xf32>
    %50 = arith.mulf %45, %49 : vector<8x8xf32>
    %51 = arith.addf %41, %50 : vector<8x8xf32>
    %c0_43 = arith.constant 0 : index
    %c0_44 = arith.constant 0 : index
    %c0_45 = arith.constant 0 : index
    %52 = vector.load %arg6[%c0_43, %c0_44, %c0_45] : memref<2x8x8xf32, #tpu.memory_space<vmem>>, vector<1x8x8xf32>
    %53 = vector.shape_cast %52 : vector<1x8x8xf32> to vector<8x8xf32>
    %54 = vector.shape_cast %51 : vector<8x8xf32> to vector<1x8x8xf32>
    tpu.vector_store %arg6[%c0_43, %c0_44, %c0_45], %54 {strides = array<i32>} : memref<2x8x8xf32, #tpu.memory_space<vmem>>, vector<1x8x8xf32>,
    %c1_46 = arith.constant 1 : index
    %c0_47 = arith.constant 0 : index
    %c0_48 = arith.constant 0 : index
    %55 = vector.load %arg5[%c1_46, %c0_47, %c0_48] : memref<2x1x8xf32, #tpu.memory_space<vmem>>, vector<1x1x8xf32>
    %56 = vector.shape_cast %55 : vector<1x1x8xf32> to vector<1x8xf32>
    %57 = vector.shape_cast %56 : vector<1x8xf32> to vector<1x8xf32>
    %58 = vector.broadcast %57 : vector<1x8xf32> to vector<8x8xf32>
    %c0_49 = arith.constant 0 : index
    %c1_50 = arith.constant 1 : index
    %c0_51 = arith.constant 0 : index
    %c0_52 = arith.constant 0 : index
    %59 = vector.load %arg4[%c0_49, %c1_50, %c0_51, %c0_52] : memref<4x2x1x8xf32, #tpu.memory_space<vmem>>, vector<1x1x1x8xf32>
    %60 = vector.shape_cast %59 : vector<1x1x1x8xf32> to vector<1x8xf32>
    %61 = vector.broadcast %60 : vector<1x8xf32> to vector<8x8xf32>
    %62 = arith.subf %1, %61 : vector<8x8xf32>
    %c0_53 = arith.constant 0 : index
    %c1_54 = arith.constant 1 : index
    %c0_55 = arith.constant 0 : index
    %c0_56 = arith.constant 0 : index
    %63 = vector.load %arg3[%c0_53, %c1_54, %c0_55, %c0_56] : memref<4x2x1x8xf32, #tpu.memory_space<vmem>>, vector<1x1x1x8xf32>
    %64 = vector.shape_cast %63 : vector<1x1x1x8xf32> to vector<1x8xf32>
    %65 = vector.broadcast %64 : vector<1x8xf32> to vector<8x8xf32>
    %66 = arith.mulf %62, %65 : vector<8x8xf32>
    %67 = arith.mulf %62, %66 : vector<8x8xf32>
    %68 = arith.addf %58, %67 : vector<8x8xf32>
    %c1_57 = arith.constant 1 : index
    %c1_58 = arith.constant 1 : index
    %c0_59 = arith.constant 0 : index
    %c0_60 = arith.constant 0 : index
    %69 = vector.load %arg4[%c1_57, %c1_58, %c0_59, %c0_60] : memref<4x2x1x8xf32, #tpu.memory_space<vmem>>, vector<1x1x1x8xf32>
    %70 = vector.shape_cast %69 : vector<1x1x1x8xf32> to vector<1x8xf32>
    %71 = vector.broadcast %70 : vector<1x8xf32> to vector<8x8xf32>
    %72 = arith.subf %3, %71 : vector<8x8xf32>
    %c1_61 = arith.constant 1 : index
    %c1_62 = arith.constant 1 : index
    %c0_63 = arith.constant 0 : index
    %c0_64 = arith.constant 0 : index
    %73 = vector.load %arg3[%c1_61, %c1_62, %c0_63, %c0_64] : memref<4x2x1x8xf32, #tpu.memory_space<vmem>>, vector<1x1x1x8xf32>
    %74 = vector.shape_cast %73 : vector<1x1x1x8xf32> to vector<1x8xf32>
    %75 = vector.broadcast %74 : vector<1x8xf32> to vector<8x8xf32>
    %76 = arith.mulf %72, %75 : vector<8x8xf32>
    %77 = arith.mulf %72, %76 : vector<8x8xf32>
    %78 = arith.addf %68, %77 : vector<8x8xf32>
    %c2_65 = arith.constant 2 : index
    %c1_66 = arith.constant 1 : index
    %c0_67 = arith.constant 0 : index
    %c0_68 = arith.constant 0 : index
    %79 = vector.load %arg4[%c2_65, %c1_66, %c0_67, %c0_68] : memref<4x2x1x8xf32, #tpu.memory_space<vmem>>, vector<1x1x1x8xf32>
    %80 = vector.shape_cast %79 : vector<1x1x1x8xf32> to vector<1x8xf32>
    %81 = vector.broadcast %80 : vector<1x8xf32> to vector<8x8xf32>
    %82 = arith.subf %5, %81 : vector<8x8xf32>
    %c2_69 = arith.constant 2 : index
    %c1_70 = arith.constant 1 : index
    %c0_71 = arith.constant 0 : index
    %c0_72 = arith.constant 0 : index
    %83 = vector.load %arg3[%c2_69, %c1_70, %c0_71, %c0_72] : memref<4x2x1x8xf32, #tpu.memory_space<vmem>>, vector<1x1x1x8xf32>
    %84 = vector.shape_cast %83 : vector<1x1x1x8xf32> to vector<1x8xf32>
    %85 = vector.broadcast %84 : vector<1x8xf32> to vector<8x8xf32>
    %86 = arith.mulf %82, %85 : vector<8x8xf32>
    %87 = arith.mulf %82, %86 : vector<8x8xf32>
    %88 = arith.addf %78, %87 : vector<8x8xf32>
    %c3_73 = arith.constant 3 : index
    %c1_74 = arith.constant 1 : index
    %c0_75 = arith.constant 0 : index
    %c0_76 = arith.constant 0 : index
    %89 = vector.load %arg4[%c3_73, %c1_74, %c0_75, %c0_76] : memref<4x2x1x8xf32, #tpu.memory_space<vmem>>, vector<1x1x1x8xf32>
    %90 = vector.shape_cast %89 : vector<1x1x1x8xf32> to vector<1x8xf32>
    %91 = vector.broadcast %90 : vector<1x8xf32> to vector<8x8xf32>
    %92 = arith.subf %7, %91 : vector<8x8xf32>
    %c3_77 = arith.constant 3 : index
    %c1_78 = arith.constant 1 : index
    %c0_79 = arith.constant 0 : index
    %c0_80 = arith.constant 0 : index
    %93 = vector.load %arg3[%c3_77, %c1_78, %c0_79, %c0_80] : memref<4x2x1x8xf32, #tpu.memory_space<vmem>>, vector<1x1x1x8xf32>
    %94 = vector.shape_cast %93 : vector<1x1x1x8xf32> to vector<1x8xf32>
    %95 = vector.broadcast %94 : vector<1x8xf32> to vector<8x8xf32>
    %96 = arith.mulf %92, %95 : vector<8x8xf32>
    %97 = arith.mulf %92, %96 : vector<8x8xf32>
    %98 = arith.addf %88, %97 : vector<8x8xf32>
    %c1_81 = arith.constant 1 : index
    %c0_82 = arith.constant 0 : index
    %c0_83 = arith.constant 0 : index
    %99 = vector.load %arg6[%c1_81, %c0_82, %c0_83] : memref<2x8x8xf32, #tpu.memory_space<vmem>>, vector<1x8x8xf32>
    %100 = vector.shape_cast %99 : vector<1x8x8xf32> to vector<8x8xf32>
    %101 = vector.shape_cast %98 : vector<8x8xf32> to vector<1x8x8xf32>
    tpu.vector_store %arg6[%c1_81, %c0_82, %c0_83], %101 {strides = array<i32>} : memref<2x8x8xf32, #tpu.memory_space<vmem>>, vector<1x8x8xf32>,
    return
  }
  func.func @transform_0(%arg0: i32, %arg1: i32) -> (i32, i32, i32) {
    %c0_i32 = arith.constant 0 : i32
    %c0_i32_0 = arith.constant 0 : i32
    %c0_i32_1 = arith.constant 0 : i32
    return %c0_i32, %arg0, %c0_i32_0 : i32, i32, i32
  }
  func.func @transform_1(%arg0: i32, %arg1: i32) -> (i32, i32, i32, i32) {
    %c0_i32 = arith.constant 0 : i32
    %c0_i32_0 = arith.constant 0 : i32
    %c0_i32_1 = arith.constant 0 : i32
    %c0_i32_2 = arith.constant 0 : i32
    return %c0_i32, %arg1, %c0_i32_0, %c0_i32_1 : i32, i32, i32, i32
  }
  func.func @transform_2(%arg0: i32, %arg1: i32) -> (i32, i32, i32, i32) {
    %c0_i32 = arith.constant 0 : i32
    %c0_i32_0 = arith.constant 0 : i32
    %c0_i32_1 = arith.constant 0 : i32
    %c0_i32_2 = arith.constant 0 : i32
    return %c0_i32, %arg1, %c0_i32_0, %c0_i32_1 : i32, i32, i32, i32
  }
  func.func @transform_3(%arg0: i32, %arg1: i32) -> (i32, i32, i32) {
    %c0_i32 = arith.constant 0 : i32
    %c0_i32_0 = arith.constant 0 : i32
    %c0_i32_1 = arith.constant 0 : i32
    return %arg1, %c0_i32, %c0_i32_0 : i32, i32, i32
  }
  func.func @transform_4(%arg0: i32, %arg1: i32) -> (i32, i32, i32) {
    %c0_i32 = arith.constant 0 : i32
    %c0_i32_0 = arith.constant 0 : i32
    return %arg1, %arg0, %c0_i32 : i32, i32, i32
  }
}

</mosaic_0001>

<bundles_post_ra>
// kernel: tpu_custom_call.1
= control target key start
LH: loop header
LB: loop body
LE: loop exit
PB: predicated region body
PF: predicated region fallthrough
CT: control target
= control target key end

     0   :  { %s1241_s0 = inlined_call_operand.hbm [shape: f32[4,8,8], index: 0, kind: input, shape index: {}]   ;;  %s1242_s1 = inlined_call_operand.hbm [shape: f32[4,4,1,8], index: 1, kind: input, shape index: {}]   ;;  %s1243_s2 = inlined_call_operand.hbm [shape: f32[4,4,1,8], index: 2, kind: input, shape index: {}]   ;;  %s1244_s3 = inlined_call_operand.vmem [shape: f32[4,1,8], index: 3, kind: input, shape index: {}]   ;;  %s1245_s4 = inlined_call_operand.hbm [shape: f32[4,8,8], index: 4, kind: output, shape index: {}]  }
   0x1   :  { %1252 = sst [smem:[#allocation19_spill]] %s1241_s0 }
   0x2   :  { %1253 = sst [smem:[#allocation20_spill]] %s1242_s1 }
   0x3   :  { %9 = vsyncpa [#allocation3], 0 }
   0x4   :  { %10 = vsyncpa [#allocation6], 0 }
   0x5   :  { %12 = vsyncpa [#allocation6 + $0x1], 0 }
   0x6   :  { %13 = vsyncpa [#allocation4], 0 }
   0x7   :  { %15 = vsyncpa [#allocation4 + $0x1], 0  ;;  %s1008_s15 = smov 0   ;;  %s1010_s16 = smov 0  }
   0x8   :  { %s1012_s17 = smov 0   ;;  %s1014_s18 = smov 0  }
   0x9   :  { %s1016_s19 = smov 0   ;;  %s1018_s20 = smov 0  }
   0xa LB: > { %s1039_s21 = sadd.s32 4294967295, %s963_s20   ;;  %s687_s22 = sadd.s32 4294967294, %s963_s20   ;;  %s963_s20 = sphi %s1018_s20, %s21_s20   ;;  %s959_s19 = sphi %s1016_s19, %s1275_s19   ;;  %s955_s18 = sphi %s1014_s18, %s1274_s18   ;;  %s951_s17 = sphi %s1012_s17, %s1273_s17   ;;  %s947_s16 = sphi %s1010_s16, %s1272_s16   ;;  %s943_s15 = sphi %s1008_s15, %s1271_s15  }
   0xb   : > { %s30_s23 = sadd.s32 1, %s959_s19  ;;  %s66_s24 = sadd.s32 1, %s951_s17 }
   0xc   : > { %p31_p0 = scmp.ge.s32.totalorder %s30_s23, 2  ;;  %p73_p1 = scmp.ne.s32.totalorder %s951_s17, %s947_s16 }
   0xd   : > { %p74_p2 = scmp.eq.s32.totalorder %s963_s20, 0  ;;  %p79_p3 = scmp.ne.s32.totalorder %s947_s16, %s943_s15 }
   0xe   : > { %s1277_s23 = smov (%p31_p0, %s30_s23), 0  ;;  %p1246_p5 = scmp.eq.s32.totalorder %s1039_s21, 0 }
   0xf   : > { %1254 = sst [smem:[#allocation18_spill]] %s1277_s23  ;;  %p1051_p4 = por %p74_p2, %p73_p1 }
  0x10   : > { %s63_s26 = ssub.s32 %s959_s19, %s1277_s23  ;;  %p157_p6 = scmp.eq.s32.totalorder %s1039_s21, 1 }
  0x11   : > { %s1255_s25 = scalar_select %p1051_p4, 1, 0 }
  0x12   : > { %p64_p7 = scmp.eq.s32.totalorder %s63_s26, 0  ;;  %p1061_p8 = por %p1246_p5, %p79_p3 }
  0x13   : > { %p1065_p9 = por %p157_p6, %p73_p1  ;;  %p163_p10 = scmp.eq.s32.totalorder %s687_s22, 1 }
  0x14   : > { %s1256_s27 = scalar_select %p1061_p8, 1, 0 }
  0x15   : > { %s1257_s28 = scalar_select %p1065_p9, 1, 0 }
  0x16   : > { %s1070_s29 = scalar_select %p64_p7, %s951_s17, %s66_s24  }
  0x17   : > { %p1072_p11 = por %p163_p10, %p79_p3  ;;  %p688_p12 = scmp.ge.s32.totalorder %s963_s20, 1 }
  0x18   : > { %p170_p13 = scmp.lt.s32.totalorder %s963_s20, 3  ;;  %s965_s6 = smov [#allocation2]  }
  0x19   : > { %s1258_s30 = scalar_select %p1072_p11, 1, 0 }
  0x1a   : > { %p1078_p0 = pnand %p688_p12, %p170_p13  ;;  %s184_s7 = sshll.u32 %s965_s6, 4  ;;  %s185_s7 = int_to_ptr.vmem [resolvable:$true] %s184_s7 }
  0x1b   : > { %s1261_s0 = sld [smem:[#allocation19_spill]] }
  0x1c   : > { %s1259_s5 = scalar_select %p1078_p0, 1, 0 }
  0x1d   : > { %p773_p1 = pneg %p1078_p0 }
  0x1f   : > { %p1086_p2 = pnand %p773_p1, %p1246_p5 }
  0x21   : > { %s849_s11 = scalar_lea.hbm %s1261_s0, 512  ;;  %p851_p6 = pneg %p1086_p2 }
  0x22   : > { %p850_p3 = scmp.ne.s32.totalorder %s1261_s0, %s849_s11  ;;  %p856_p12 = scmp.lt.u32.totalorder %s849_s11, %s1261_s0 }
  0x24   : > { %p852_p7 = pnand %p851_p6, %p850_p3 }
  0x26   : > { %p853_p10 = pneg %p852_p7 }
  0x28   : > { %p858_p13 = pnand %p856_p12, %p853_p10 }
  0x2a   : > { %861 = shalt.err (!%p858_p13)
}
  0x2b   : > { %s862_s24 = scalar_lea.vmem %s185_s7, 512  ;;  %p870_p9 = scmp.lt.s32.totalorder %s185_s7, %s185_s7 }
  0x2c   : > { %p863_p1 = scmp.ne.s32.totalorder %s185_s7, %s862_s24  ;;  %p871_p8 = scmp.lt.s32.totalorder %s862_s24, %s862_s24 }
  0x2e   : > { %p865_p5 = pnand %p863_p1, %p851_p6  ;;  %p872_p0 = por %p871_p8, %p870_p9 }
  0x30   : > { %p866_p11 = pneg %p865_p5 }
  0x32   : > { %p873_p4 = pnand %p872_p0, %p866_p11 }
  0x34   : > { %876 = shalt.err (!%p873_p4)
}
  0x35   : > { %s966_s26 = smov 128   ;;  %s967_s6 = smov 8  }
  0x36   : > { %776 = dma.hbm_to_vmem [thread:$0]  (!%p1086_p2), %s1261_s0, 512, %s185_s7, [#allocation3], %s966_s26, %s966_s26, %s967_s6  }
  0x37   : > { %p690_p3 = scmp.ge.s32.totalorder %s963_s20, 2 }
  0x39   : > { %194 = sbr.rel (%p690_p3) target bundleno = 91 (0x5b), region = 20 }
  0x40   : > { %s198_s11 = sand.u32 1, %s963_s20   ;;  %s200_s12 = sand.u32 1, %s951_s17  }
  0x41   : > { %s691_s8 = sshll.u32 %s200_s12, 3  ;;  %s746_s13 = sshll.u32 %s959_s19, 5 }
  0x42   : > { %s1262_s1 = sld [smem:[#allocation20_spill]]  ;;  %p1263_p4 = scmp.ne.s32.totalorder %s1255_s25, 0 }
  0x43   : > { %s202_s26 = scalar_lea.vmem [#allocation5], %s691_s8  ;;  %s968_s10 = smov 64  }
  0x44   : > { %s751_s24 = scalar_select %p1263_p4, [#allocation0], [#allocation13] }
  0x45   : > { %s221_s6 = sshll.u32 %s202_s26, 4  ;;  %752 = sst [smem:[#allocation10]] (%p1263_p4), %s968_s10  ;;  %s222_s6 = int_to_ptr.vmem [resolvable:$true] %s221_s6 }
  0x46   : > { %s213_s9 = sld [smem:[%s751_s24]]   ;;  %s969_s0 = smov 32  }
  0x47   : > { %753 = sst [smem:[#allocation10 + $0x1]] (%p1263_p4), %s969_s0  ;;  %s970_s12 = smov 2  }
  0x48   : > { %s208_s22 = scalar_lea.hbm %s1262_s1, %s746_s13  ;;  %754 = sst [smem:[#allocation10 + $0x2]] (%p1263_p4), %s970_s12 }
  0x49   : > { %s971_s23 = smov 16   ;;  %s972_s7 = smov 1  }
  0x4a   : > { %755 = sst [smem:[#allocation10 + $0x3]] (%p1263_p4), %s971_s23  ;;  %s199_s26 = scalar_lea.sflag [#allocation6], %s198_s11 }
  0x4b   : > { %756 = sst [smem:[#allocation10 + $0x4]] (%p1263_p4), %s971_s23  ;;  %s973_s1 = smov [#allocation9]  }
  0x4c   : > { %s694_s14 = sshll.u32 %s213_s9, 26  ;;  %757 = sst [smem:[#allocation10 + $0x5]] (%p1263_p4), %s972_s7 }
  0x4d   : > { %s695_s24 = sadd.s32 134217728, %s694_s14 }
  0x4e   : > { %758 = dma.general (%p1263_p4), %s208_s22, 128, %s222_s6, %s199_s26, %s973_s1, [#allocation10], %s695_s24, 0  }
  0x4f   : > { %s254_s12 = scalar_lea.hbm %s1243_s2, %s746_s13  ;;  %s248_s9 = scalar_lea.vmem [#allocation7], %s691_s8 }
  0x50   : > { %s759_s23 = scalar_select %p1263_p4, [#allocation0], [#allocation14] }
  0x51   : > { %s267_s7 = sshll.u32 %s248_s9, 4  ;;  %s974_s11 = smov 64   ;;  %s268_s7 = int_to_ptr.vmem [resolvable:$true] %s267_s7 }
  0x52   : > { %s259_s14 = sld [smem:[%s759_s23]]   ;;  %s975_s1 = smov 32  }
  0x53   : > { %760 = sst [smem:[#allocation12]] (%p1263_p4), %s974_s11  ;;  %s976_s22 = smov 2  }
  0x54   : > { %761 = sst [smem:[#allocation12 + $0x1]] (%p1263_p4), %s975_s1  ;;  %s977_s6 = smov 16  }
  0x55   : > { %762 = sst [smem:[#allocation12 + $0x2]] (%p1263_p4), %s976_s22  ;;  %s978_s8 = smov 1  }
  0x56   : > { %763 = sst [smem:[#allocation12 + $0x3]] (%p1263_p4), %s977_s6  ;;  %s979_s10 = smov [#allocation11]  }
  0x57   : > { %764 = sst [smem:[#allocation12 + $0x4]] (%p1263_p4), %s977_s6 }
  0x58   : > { %s699_s13 = sshll.u32 %s259_s14, 26  ;;  %765 = sst [smem:[#allocation12 + $0x5]] (%p1263_p4), %s978_s8 }
  0x59   : > { %s700_s24 = sadd.s32 134217728, %s699_s13 }
  0x5a   : > { %766 = dma.general (%p1263_p4), %s254_s12, 128, %s268_s7, %s199_s26, %s979_s10, [#allocation12], %s700_s24, 0  }
  0x5b PF: > { %p1264_p5 = scmp.ne.s32.totalorder %s1259_s5, 0 }
  0x5c   : > { %p1265_p8 = scmp.eq.s32.totalorder (!%p1264_p5), %s1039_s21, 0 }
  0x5d   : > { %300 = sbr.rel (%p1264_p5) target bundleno = 140 (0x8c), region = 36 }
  0x64   : > { %930 = dma.done.wait (%p1265_p8), [#allocation3], 512   ;;  %p1266_p9 = pmov %p1265_p8 }
  0x65   : > { %s306_s0 = sand.u32 1, %s1039_s21   ;;  %s1158_s23 = sand.u32 1, %s947_s16  }
  0x66   : > { %932 = vsyncadd (%p1266_p9), [#allocation3], 4294966784  ;;  %s703_s9 = sshll.u32 %s1158_s23, 3  ;;  %s307_s25 = scalar_lea.sflag [#allocation6], %s306_s0 }
  0x67   : > { %s1161_s26 = scalar_lea.vmem [#allocation5], %s703_s9  ;;  %p1267_p11 = scmp.ne.s32.totalorder %s1256_s27, 0 }
  0x69   : > { %934 = dma.done.wait (%p1267_p11), %s307_s25, 256  }
  0x6a   : > { %936 = vsyncadd (%p1267_p11), %s307_s25, 4294967040  ;;  %s706_s5 = sshll.u32 %s955_s18, 1  ;;  %v361_v0 = vld [vmem:[#allocation2] sm:$0xff]  ;;  %v363_v1 = vld [vmem:[#allocation2 + $0x8] sm:$0xff]  ;;  %s705_s21 = sshll.u32 %s1158_s23, 4  ;;  %vm453_vm0 = vcmask 64512  }
  0x6b   : > { %p356_p0 = scmp.lt.s32.totalorder %s706_s5, 3  ;;  %v365_v2 = vld [vmem:[#allocation2 + $0x10] sm:$0xff]  ;;  %v367_v3 = vld [vmem:[#allocation2 + $0x18] sm:$0xff]  ;;  %s319_s27 = scalar_lea.vmem [#allocation7], %s703_s9  ;;  %v709_v6 = vld [vmem:[%s1161_s26] ss:$0 sm:$0xff] }
  0x6c   : > { %v708_v4 = vld [vmem:[%s319_s27] ss:$0 sm:$0xff]  ;;  %v711_v7 = vld [vmem:[%s319_s27 + $0x2] ss:$0 sm:$0xff]  ;;  %v713_v8 = vld [vmem:[%s1161_s26 + $0x2] ss:$0 sm:$0xff] }
  0x6d   : > { %s1279_s5 = smov (!%p356_p0, %s706_s5), 3  ;;  %v382_v5 = vsub.f32 %v361_v0, %v708_v4  ;;  %v401_v9 = vsub.f32 %v363_v1, %v711_v7  ;;  %v715_v10 = vld [vmem:[%s319_s27 + $0x4] ss:$0 sm:$0xff]  ;;  %v717_v11 = vld [vmem:[%s1161_s26 + $0x4] ss:$0 sm:$0xff]  ;;  %s352_s11 = scalar_lea.vmem [#allocation8], %s705_s21 }
  0x6e   : > { %s1172_s14 = scalar_lea.vmem %s1244_s3, %s1279_s5  ;;  %v719_v12 = vld [vmem:[%s319_s27 + $0x6] ss:$0 sm:$0xff]  ;;  %v421_v15 = vsub.f32 %v365_v2, %v715_v10  ;;  %v721_v17 = vld [vmem:[%s1161_s26 + $0x6] ss:$0 sm:$0xff]  ;;  %v725_v18 = vld [vmem:[%s319_s27 + $0x1] ss:$0 sm:$0xff] }
  0x6f   : > { %v707_v13 = vld [vmem:[%s1172_s14] ss:$0 sm:$0xff]  ;;  %v390_v14 = vmul.f32 %v709_v6, %v382_v5  ;;  %v441_v16 = vsub.f32 %v367_v3, %v719_v12  ;;  %v410_v19 = vmul.f32 %v713_v8, %v401_v9  ;;  %v471_v20 = vsub.f32 %v361_v0, %v725_v18  ;;  %v727_v21 = vld [vmem:[%s1161_s26 + $0x1] ss:$0 sm:$0xff]  ;;  %v729_v22 = vld [vmem:[%s319_s27 + $0x3] ss:$0 sm:$0xff] }
  0x70   : > { %v731_v23 = vld [vmem:[%s1161_s26 + $0x3] ss:$0 sm:$0xff]  ;;  %v430_v25 = vmul.f32 %v717_v11, %v421_v15  ;;  %v491_v27 = vsub.f32 %v363_v1, %v729_v22  ;;  %v733_v28 = vld [vmem:[%s319_s27 + $0x5] ss:$0 sm:$0xff]  ;;  %v735_v29 = vld [vmem:[%s1161_s26 + $0x5] ss:$0 sm:$0xff] }
  0x71   : > { %v391_v24 = vmul.f32 %v390_v14, %v382_v5  ;;  %v450_v26 = vmul.f32 %v721_v17, %v441_v16  ;;  %v737_v30 = vld [vmem:[%s319_s27 + $0x7] ss:$0 sm:$0xff]  ;;  %v411_v31 = vmul.f32 %v410_v19, %v401_v9  ;;  %v480_v32 = vmul.f32 %v727_v21, %v471_v20  ;;  %v739_v35 = vld [vmem:[%s1161_s26 + $0x7] ss:$0 sm:$0xff]  ;;  %v723_v38 = vld [vmem:[%s1172_s14 + $0x1] ss:$0 sm:$0xff] }
  0x72   : > { %v511_v33 = vsub.f32 %v365_v2, %v733_v28  ;;  %v531_v34 = vsub.f32 %v367_v3, %v737_v30  ;;  %v431_v37 = vmul.f32 %v430_v25, %v421_v15  ;;  %v500_v39 = vmul.f32 %v731_v23, %v491_v27  ;;  %s560_s1 = sshll.u32 %s352_s11, 4  ;;  %s748_s22 = sshll.u32 %s955_s18, 8  ;;  %s1187_s1 = int_to_ptr.vmem [resolvable:$true] %s560_s1 }
  0x73   : > { %v392_v36 = vadd.f32 %v707_v13, %v391_v24  ;;  %v481_v40 = vmul.f32 %v480_v32, %v471_v20  ;;  %v451_v44 = vmul.f32 %v450_v26, %v441_v16  ;;  %s1192_s8 = scalar_lea.hbm %s1245_s4, %s748_s22  ;;  %s546_s24 = scalar_lea.sflag [#allocation4], %s1158_s23 }
  0x74   : > { %v520_v41 = vmul.f32 %v735_v29, %v511_v33  ;;  %v540_v42 = vmul.f32 %v739_v35, %v531_v34  ;;  %v501_v45 = vmul.f32 %v500_v39, %v491_v27  ;;  %s877_s10 = scalar_lea.vmem %s1187_s1, 256  ;;  %p1268_p6 = scmp.ne.s32.totalorder %s1257_s28, 0 }
  0x75   : > { %v412_v43 = vadd.f32 %v411_v31, %v392_v36  ;;  %v482_v46 = vadd.f32 %v723_v38, %v481_v40  ;;  %p878_p2 = scmp.ne.s32.totalorder %s1187_s1, %s877_s10  ;;  %s980_s18 = smov [#allocation8]  }
  0x76   : > { %v521_v47 = vmul.f32 %v520_v41, %v511_v33  ;;  %v541_v50 = vmul.f32 %v540_v42, %v531_v34  ;;  %s881_s0 = sshll.u32 %s980_s18, 4  ;;  %s882_s0 = int_to_ptr.vmem [resolvable:$false] %s881_s0 }
  0x77   : > { %v432_v48 = vadd.f32 %v431_v37, %v412_v43  ;;  %v502_v49 = vadd.f32 %v501_v45, %v482_v46  ;;  %p879_p7 = pnand %p878_p2, %p1268_p6  ;;  %s883_s9 = scalar_lea.vmem %s882_s0, 512 }
  0x78   : > { %p884_p12 = scmp.lt.s32.totalorder %s1187_s1, %s882_s0  ;;  %p885_p13 = scmp.lt.s32.totalorder %s883_s9, %s877_s10 }
  0x79   : > { %v452_v51 = vadd.f32 %v451_v44, %v432_v48  ;;  %v522_v52 = vadd.f32 %v521_v47, %v502_v49  ;;  %p880_p10 = pneg %p879_p7 }
  0x7a   : > { %p886_p1 = por %p885_p13, %p884_p12 }
  0x7b   : > { %454 = vst.msk [vmem:[%s352_s11] sm:$0xff] %vm453_vm0, %v452_v51  ;;  %v542_v53 = vadd.f32 %v541_v50, %v522_v52 }
  0x7c   : > { %p887_p4 = pnand %p886_p1, %p880_p10 }
  0x7d   : > { %740 = vst.msk [vmem:[%s352_s11 + $0x8] sm:$0xff] %vm453_vm0, %v542_v53 }
  0x7e   : > { %890 = shalt.err (!%p887_p4)
}
  0x7f   : > { %s891_s25 = scalar_lea.hbm %s1192_s8, 256  ;;  %s895_s21 = scalar_lea.hbm %s1245_s4, 512 }
  0x80   : > { %p892_p5 = scmp.ne.s32.totalorder %s1192_s8, %s891_s25  ;;  %p896_p11 = scmp.lt.u32.totalorder %s1192_s8, %s1245_s4 }
  0x81   : > { %p897_p0 = scmp.lt.u32.totalorder %s895_s21, %s891_s25  ;;  %p899_p7 = scmp.lt.u32.totalorder %s891_s25, %s1192_s8 }
  0x82   : > { %p893_p8 = pnand %p892_p5, %p1268_p6 }
  0x83   : > { %p898_p2 = por %p897_p0, %p896_p11 }
  0x84   : > { %p894_p9 = pneg %p893_p8 }
  0x85   : > { %p900_p10 = por %p899_p7, %p898_p2 }
  0x87   : > { %p901_p12 = pnand %p900_p10, %p894_p9 }
  0x89   : > { %904 = shalt.err (!%p901_p12)
}
  0x8a   : > { %s981_s14 = smov 128   ;;  %s982_s27 = smov 8  }
  0x8b   : > { %771 = dma.vmem_to_hbm [thread:$0]  (%p1268_p6), %s1187_s1, 256, %s1192_s8, %s546_s24, %s981_s14, %s981_s14, %s982_s27  }
  0x8c PF: > { %s575_s11 = sand.u32 1, %s943_s15   ;;  %p1269_p13 = scmp.ne.s32.totalorder %s1258_s30, 0 }
  0x8d   : > { %s576_s22 = scalar_lea.sflag [#allocation4], %s575_s11 }
  0x8e   : > { %p778_p1 = pnand %p690_p3, %p1269_p13 }
  0x90   : > { %938 = dma.done.wait (!%p778_p1), %s576_s22, 256  }
  0x91   : > { %940 = vsyncadd (!%p778_p1), %s576_s22, 4294967040  ;;  %s21_s20 = sadd.s32 1, %s963_s20   ;;  %s1270_s28 = sld [smem:[#allocation18_spill]] }
  0x92   : > { %p18_p4 = scmp.ge.s32.totalorder %s21_s20, 4   ;;  %s1271_s15 = smov %s947_s16 }
  0x93   : > { %s1272_s16 = smov %s951_s17  ;;  %s1273_s17 = smov %s1070_s29 }
  0x94   : > { %s1274_s18 = smov %s959_s19  ;;  %20 = sbr.rel (!%p18_p4) target bundleno = 10 (0xa), region = 130 }
  0x97   : > { %s1275_s19 = smov %s1270_s28 }
  0x9b   :  { %581 = vsyncpa [#allocation3], 1 }
  0x9c   :  { %583 = vsyncpa [#allocation3 + $0x1], 1 }
  0x9d   :  { %584 = vsyncpa [#allocation6], 1 }
  0x9e   :  { %586 = vsyncpa [#allocation6 + $0x1], 1 }
  0x9f   :  { %587 = vsyncpa [#allocation4], 1 }
  0xa0   :  { %589 = vsyncpa [#allocation4 + $0x1], 1 }

</bundles_post_ra>
